<compile_context>
chip_gen: v5e
topology: v5e:2x2
jax: 0.10.0
libtpu: 0.0.40
codegen_flags: <defaults>
</compile_context>

<pallas_src>
import jax
import jax.numpy as jnp
from jax.experimental import pallas as pl
from jax.experimental.pallas import tpu as pltpu


def linqn1_kernel(x_ref, w_ref, b_ref, o_ref):
    """out = x @ W.T + b, computed as VPU scalar-broadcast FMAs (no MXU).

    x_ref: (B, C) activations in VMEM.
    w_ref: (A, C) weight in SMEM (PyTorch nn.Linear layout, no transpose).
    b_ref: (A,)   bias in SMEM.
    o_ref: (B, A) output in VMEM.
    """
    B, C = x_ref.shape
    A = w_ref.shape[0]

    x = x_ref[...].astype(jnp.float32)   # (B, C), f32 accumulation

    # Statically unrolled over the tiny A (=2) and C (=4) dims: each output
    # column is bias[a] + sum_c x[:, c] * w[a, c], with w[a, c]/b[a] read as
    # SMEM scalars and broadcast by the VPU across the batch vector.
    cols = []
    for a in range(A):
        acc = jnp.full((B, 1), b_ref[a], dtype=jnp.float32)
        for c in range(C):
            acc = acc + x[:, c:c + 1] * w_ref[a, c]
        cols.append(acc)

    o_ref[...] = jnp.concatenate(cols, axis=1).astype(o_ref.dtype)


def linqn1_forward(x, weight, bias):
    """Q(x) = x @ weight.T + bias  (exact nn.Linear semantics).

    x:      (B, C) activations
    weight: (A, C) PyTorch-layout weight
    bias:   (A,)
    returns (B, A)
    """
    B, C = x.shape
    A, C2 = weight.shape
    assert C == C2 and bias.shape == (A,)

    # Single ungridded invocation: whole (tiny) operands staged once.
    # Weight/bias go to SMEM (scalar table), activations/output to VMEM.
    # Full-extent operands are exempt from the (8,128) block divisibility rule.
    # TODO(synk): if batch grows, tile B with a "parallel" grid axis and keep
    # the output lane-dense (batch-last / packed actions) per the perf review.
    return pl.pallas_call(
        linqn1_kernel,
        out_shape=jax.ShapeDtypeStruct((B, A), x.dtype),
        in_specs=[
            pl.BlockSpec(memory_space=pltpu.MemorySpace.VMEM),   # x
            pl.BlockSpec(memory_space=pltpu.MemorySpace.SMEM),   # weight
            pl.BlockSpec(memory_space=pltpu.MemorySpace.SMEM),   # bias
        ],
        out_specs=pl.BlockSpec(memory_space=pltpu.MemorySpace.VMEM),
    )(x, weight, bias)


def init_linqn1_params(key, in_channels=4, num_actions=2, dtype=jnp.float32):
    """Deterministic init mirroring PyTorch nn.Linear default:
    U(-1/sqrt(in_channels), 1/sqrt(in_channels)) for both weight and bias."""
    kw, kb = jax.random.split(key)
    bound = 1.0 / jnp.sqrt(jnp.float32(in_channels))
    weight = jax.random.uniform(kw, (num_actions, in_channels),
                                minval=-bound, maxval=bound, dtype=dtype)
    bias = jax.random.uniform(kb, (num_actions,),
                              minval=-bound, maxval=bound, dtype=dtype)
    return weight, bias


if __name__ == "__main__":
    key = jax.random.PRNGKey(0)
    k_x, k_p = jax.random.split(key)

    batch, in_channels, num_actions = 2, 4, 2
    x = jax.random.normal(k_x, (batch, in_channels), dtype=jnp.float32)
    weight, bias = init_linqn1_params(k_p, in_channels, num_actions)

    out = linqn1_forward(x, weight, bias)
    out = jax.block_until_ready(out)

    # Sanity check against plain JAX reference (same math as nn.Linear).
    ref = x @ weight.T + bias
    assert out.shape == (batch, num_actions)
    assert jnp.allclose(out, ref, atol=1e-5, rtol=1e-5)

    print("KERNEL_OK")
</pallas_src>

<mosaic_0001>
module attributes {stable_mosaic.version = 11 : i64} {
  func.func @linqn1_kernel(%arg0: memref<2x4xf32, #tpu.memory_space<vmem>>, %arg1: memref<2x4xf32, #tpu.memory_space<smem>>, %arg2: memref<2xf32, #tpu.memory_space<smem>>, %arg3: memref<2x2xf32, #tpu.memory_space<vmem>>) attributes {dimension_semantics = [], scalar_prefetch = 0 : i64, scratch_operands = 0 : i64, tpu.core_type = #tpu.core_type<tc>} {
    %c0 = arith.constant 0 : index
    %c0_0 = arith.constant 0 : index
    %0 = vector.load %arg0[%c0, %c0_0] : memref<2x4xf32, #tpu.memory_space<vmem>>, vector<2x4xf32>
    %c0_1 = arith.constant 0 : index
    %1 = memref.load %arg2[%c0_1] : memref<2xf32, #tpu.memory_space<smem>>
    %2 = vector.broadcast %1 : f32 to vector<2x1xf32>
    %3 = vector.extract_strided_slice %0 {offsets = [0, 0], sizes = [2, 1], strides = [1, 1]} : vector<2x4xf32> to vector<2x1xf32>
    %c0_2 = arith.constant 0 : index
    %c0_3 = arith.constant 0 : index
    %4 = memref.load %arg1[%c0_2, %c0_3] : memref<2x4xf32, #tpu.memory_space<smem>>
    %5 = vector.broadcast %4 : f32 to vector<2x1xf32>
    %6 = arith.mulf %3, %5 : vector<2x1xf32>
    %7 = arith.addf %2, %6 : vector<2x1xf32>
    %8 = vector.extract_strided_slice %0 {offsets = [0, 1], sizes = [2, 1], strides = [1, 1]} : vector<2x4xf32> to vector<2x1xf32>
    %c0_4 = arith.constant 0 : index
    %c1 = arith.constant 1 : index
    %9 = memref.load %arg1[%c0_4, %c1] : memref<2x4xf32, #tpu.memory_space<smem>>
    %10 = vector.broadcast %9 : f32 to vector<2x1xf32>
    %11 = arith.mulf %8, %10 : vector<2x1xf32>
    %12 = arith.addf %7, %11 : vector<2x1xf32>
    %13 = vector.extract_strided_slice %0 {offsets = [0, 2], sizes = [2, 1], strides = [1, 1]} : vector<2x4xf32> to vector<2x1xf32>
    %c0_5 = arith.constant 0 : index
    %c2 = arith.constant 2 : index
    %14 = memref.load %arg1[%c0_5, %c2] : memref<2x4xf32, #tpu.memory_space<smem>>
    %15 = vector.broadcast %14 : f32 to vector<2x1xf32>
    %16 = arith.mulf %13, %15 : vector<2x1xf32>
    %17 = arith.addf %12, %16 : vector<2x1xf32>
    %18 = vector.extract_strided_slice %0 {offsets = [0, 3], sizes = [2, 1], strides = [1, 1]} : vector<2x4xf32> to vector<2x1xf32>
    %c0_6 = arith.constant 0 : index
    %c3 = arith.constant 3 : index
    %19 = memref.load %arg1[%c0_6, %c3] : memref<2x4xf32, #tpu.memory_space<smem>>
    %20 = vector.broadcast %19 : f32 to vector<2x1xf32>
    %21 = arith.mulf %18, %20 : vector<2x1xf32>
    %22 = arith.addf %17, %21 : vector<2x1xf32>
    %c1_7 = arith.constant 1 : index
    %23 = memref.load %arg2[%c1_7] : memref<2xf32, #tpu.memory_space<smem>>
    %24 = vector.broadcast %23 : f32 to vector<2x1xf32>
    %25 = vector.extract_strided_slice %0 {offsets = [0, 0], sizes = [2, 1], strides = [1, 1]} : vector<2x4xf32> to vector<2x1xf32>
    %c1_8 = arith.constant 1 : index
    %c0_9 = arith.constant 0 : index
    %26 = memref.load %arg1[%c1_8, %c0_9] : memref<2x4xf32, #tpu.memory_space<smem>>
    %27 = vector.broadcast %26 : f32 to vector<2x1xf32>
    %28 = arith.mulf %25, %27 : vector<2x1xf32>
    %29 = arith.addf %24, %28 : vector<2x1xf32>
    %30 = vector.extract_strided_slice %0 {offsets = [0, 1], sizes = [2, 1], strides = [1, 1]} : vector<2x4xf32> to vector<2x1xf32>
    %c1_10 = arith.constant 1 : index
    %c1_11 = arith.constant 1 : index
    %31 = memref.load %arg1[%c1_10, %c1_11] : memref<2x4xf32, #tpu.memory_space<smem>>
    %32 = vector.broadcast %31 : f32 to vector<2x1xf32>
    %33 = arith.mulf %30, %32 : vector<2x1xf32>
    %34 = arith.addf %29, %33 : vector<2x1xf32>
    %35 = vector.extract_strided_slice %0 {offsets = [0, 2], sizes = [2, 1], strides = [1, 1]} : vector<2x4xf32> to vector<2x1xf32>
    %c1_12 = arith.constant 1 : index
    %c2_13 = arith.constant 2 : index
    %36 = memref.load %arg1[%c1_12, %c2_13] : memref<2x4xf32, #tpu.memory_space<smem>>
    %37 = vector.broadcast %36 : f32 to vector<2x1xf32>
    %38 = arith.mulf %35, %37 : vector<2x1xf32>
    %39 = arith.addf %34, %38 : vector<2x1xf32>
    %40 = vector.extract_strided_slice %0 {offsets = [0, 3], sizes = [2, 1], strides = [1, 1]} : vector<2x4xf32> to vector<2x1xf32>
    %c1_14 = arith.constant 1 : index
    %c3_15 = arith.constant 3 : index
    %41 = memref.load %arg1[%c1_14, %c3_15] : memref<2x4xf32, #tpu.memory_space<smem>>
    %42 = vector.broadcast %41 : f32 to vector<2x1xf32>
    %43 = arith.mulf %40, %42 : vector<2x1xf32>
    %44 = arith.addf %39, %43 : vector<2x1xf32>
    %45 = tpu.concatenate %22, %44 in 1 : vector<2x1xf32>, vector<2x1xf32> -> vector<2x2xf32>
    %c0_16 = arith.constant 0 : index
    %c0_17 = arith.constant 0 : index
    %46 = vector.load %arg3[%c0_16, %c0_17] : memref<2x2xf32, #tpu.memory_space<vmem>>, vector<2x2xf32>
    tpu.vector_store %arg3[%c0_16, %c0_17], %45 {strides = array<i32>} : memref<2x2xf32, #tpu.memory_space<vmem>>, vector<2x2xf32>,
    return
  }
}

</mosaic_0001>

<bundles_post_ra>
// kernel: tpu_custom_call.1
= control target key start
LH: loop header
LB: loop body
LE: loop exit
PB: predicated region body
PF: predicated region fallthrough
CT: control target
= control target key end

     0   :  { %8 = vsyncpa [#allocation3], 0  ;;  %s278_s0 = inlined_call_operand.hbm [shape: f32[2,4], index: 0, kind: input, shape index: {}]   ;;  %s279_s1 = inlined_call_operand.hbm [shape: f32[2,4], index: 1, kind: input, shape index: {}]   ;;  %s280_s2 = inlined_call_operand.vmem [shape: f32[2], index: 2, kind: input, shape index: {}]   ;;  %s281_s3 = inlined_call_operand.hbm [shape: f32[2,2], index: 3, kind: output, shape index: {}]  }
   0x1   :  { %9 = vsyncpa [#allocation5], 0 }
   0x2   :  { %10 = vsyncpa [#allocation6], 0 }
   0x3   :  { %11 = vsyncpa [#allocation4], 0  ;;  %s17_s14 = sshll.u32 %s278_s0, 4  ;;  %s238_s15 = smov [#allocation2]   ;;  %s18_s14 = int_to_ptr.hbm [resolvable:$true] %s17_s14 }
   0x4   :  { %s19_s16 = sshll.u32 %s238_s15, 4  ;;  %s28_s19 = sshll.u32 %s279_s1, 4  ;;  %s20_s16 = int_to_ptr.vmem [resolvable:$true] %s19_s16  ;;  %s29_s19 = int_to_ptr.hbm [resolvable:$true] %s28_s19 }
   0x5   :  { %22 = dma.hbm_to_vmem [thread:$0]  %s18_s14, 32, %s20_s16, [#allocation3]  }
   0x6   :  { %s239_s20 = smov [#allocation7]   ;;  %s37_s23 = sshll.u32 %s280_s2, 4  ;;  %s38_s23 = int_to_ptr.vmem [resolvable:$true] %s37_s23 }
   0x7   :  { %31 = dma.hbm_to_smem %s29_s19, 32, %s239_s20, [#allocation5]  }
   0x8   :  { %s240_s24 = smov [#allocation8]  }
   0x9   :  { %40 = dma.vmem_to_smem %s38_s23, 16, %s240_s24, [#allocation6]  }
   0xa   :  { %230 = dma.done.wait [#allocation3], 32  }
   0xb   :  { %231 = vsyncadd [#allocation3], 4294967264 }
   0xc   :  { %232 = dma.done.wait [#allocation5], 32  }
   0xd   :  { %233 = vsyncadd [#allocation5], 4294967264 }
   0xe   :  { %234 = dma.done.wait [#allocation6], 16  }
   0xf   :  { %235 = vsyncadd [#allocation6], 4294967280 }
  0x10   :  { %53 = sfence }
  0x11   :  { %s147_s0 = sld [smem:[#allocation7 + $0x81]]  ;;  %v54_v0 = vld [vmem:[#allocation2] sm:$0x3]  ;;  %s241_s26 = smov 127   ;;  %vm119_vm0 = vcmask 7168   ;;  %vm121_vm1 = vcmask 9216  }
  0x12   :  { %s148_s1 = sld [smem:[#allocation7 + $0x82]]  ;;  %s242_s2 = smov 125  }
  0x13   :  { %s149_s25 = sld [smem:[#allocation7 + $0x83]]  ;;  %s243_s27 = smov 126  }
  0x14   :  { %s142_s28 = sld [smem:[#allocation7 + $0x1]]  ;;  %s244_s6 = smov 1  }
  0x15   :  { %s143_s29 = sld [smem:[#allocation7 + $0x2]]  ;;  %s245_s9 = smov [#allocation9]  }
  0x16   :  { %s144_s30 = sld [smem:[#allocation7 + $0x3]]  ;;  %s128_s10 = sshll.u32 %s245_s9, 4  ;;  %s129_s10 = int_to_ptr.vmem [resolvable:$true] %s128_s10 }
  0x17   :  { %v92_v1 = vstv %s147_s0  ;;  %s146_s4 = sld [smem:[#allocation7 + $0x80]]  ;;  %s130_s13 = sshll.u32 %s281_s3, 4  ;;  %s131_s13 = int_to_ptr.hbm [resolvable:$true] %s130_s13 }
  0x18   :  { %v93_v2 = vmul.f32 %v92_v1, %v54_v0  ;;  %v100_v5 = vstv %s148_s1  ;;  %s145_s5 = sld [smem:[#allocation8 + $0x1]] }
  0x19   :  { %v108_v3 = vstv %s149_s25  ;;  %v101_v6 = vmul.f32 %v100_v5, %v54_v0  ;;  %s57_s7 = sld [smem:[#allocation7]] }
  0x1a   :  { %95 = vrot.lane.b32.xlu0 %v93_v2, %s241_s26  ;;  %v109_v4 = vmul.f32 %v108_v3, %v54_v0  ;;  %v62_v7 = vstv %s142_s28  ;;  %s55_s8 = sld [smem:[#allocation8]] }
  0x1b   :  { %v63_v8 = vmul.f32 %v62_v7, %v54_v0  ;;  %v70_v9 = vstv %s143_s29 }
  0x1c   :  { %111 = vrot.lane.b32.xlu1 %v109_v4, %s242_s2  ;;  %v71_v10 = vmul.f32 %v70_v9, %v54_v0  ;;  %v78_v11 = vstv %s144_s30 }
  0x1d   :  { %v79_v12 = vmul.f32 %v78_v11, %v54_v0  ;;  %v88_v13 = vstv %s146_s4 }
  0x1e   :  { %73 = vrot.lane.b32.xlu2 %v71_v10, %s243_s27  ;;  %v89_v14 = vmul.f32 %v88_v13, %v54_v0  ;;  %v86_v15 = vstv %s145_s5 }
  0x1f   :  { %v58_v23 = vstv %s57_s7 }
  0x20   :  { %v90_v17 = vadd.f32 %v89_v14, %v86_v15  ;;  %v59_v24 = vmul.f32 %v58_v23, %v54_v0  ;;  %v56_v25 = vstv %s55_s8 }
  0x22   :  { %103 = vrot.lane.b32.xlu0 %v101_v6, %s243_s27  ;;  %v60_v27 = vadd.f32 %v59_v24, %v56_v25 }
  0x24   :  { %65 = vrot.lane.b32.xlu1 %v63_v8, %s241_s26 }
  0x26   :  { %81 = vrot.lane.b32.xlu2 %v79_v12, %s242_s2 }
  0x78   :  { %v74_v26 = vpop.permute.xlu2 %73 }
  0x80   :  { %v82_v31 = vpop.permute.xlu2 %81 }
  0x8c   :  { %v96_v16 = vpop.permute.xlu0 %95 }
  0x8d   :  { %v98_v18 = vadd.f32 %v96_v16, %v90_v17 }
  0x8e   :  { %v112_v20 = vpop.permute.xlu1 %111 }
  0x94   :  { %v104_v19 = vpop.permute.xlu0 %103 }
  0x95   :  { %v106_v21 = vadd.f32 %v104_v19, %v98_v18 }
  0x96   :  { %v66_v28 = vpop.permute.xlu1 %65 }
  0x97   :  { %v114_v22 = vadd.f32 %v112_v20, %v106_v21  ;;  %v68_v29 = vadd.f32 %v66_v28, %v60_v27 }
  0x99   :  { %116 = vrot.lane.b32.xlu0 %v114_v22, %s244_s6  ;;  %v76_v30 = vadd.f32 %v74_v26, %v68_v29 }
  0x9b   :  { %v84_v32 = vadd.f32 %v82_v31, %v76_v30 }
 0x10b   :  { %v117_v33 = vpop.permute.xlu0 %116 }
 0x10c   :  { %v120_v34 = vsel %vm119_vm0, %v84_v32, %v117_v33 }
 0x10d   :  { %122 = vst.msk [vmem:[#allocation9] sm:$0x3] %vm121_vm1, %v120_v34 }
 0x10e   :  { %133 = dma.vmem_to_hbm [thread:$0]  %s129_s10, 32, %s131_s13, [#allocation4]  }
 0x10f   :  { %236 = dma.done.wait [#allocation4], 32  }
 0x110   :  { %237 = vsyncadd [#allocation4], 4294967264 }
 0x111   :  { %138 = vsyncpa [#allocation3], 1 }
 0x112   :  { %139 = vsyncpa [#allocation4], 1 }
 0x113   :  { %140 = vsyncpa [#allocation5], 1 }
 0x114   :  { %141 = vsyncpa [#allocation6], 1 }

</bundles_post_ra>
